<compile_context>
chip_gen: v7x
topology: tpu7x:2x2x1
jax: 0.10.0
libtpu: 0.0.40
codegen_flags: <defaults>
</compile_context>

<pallas_src>
import collections.abc
import math
from itertools import repeat

import jax
import jax.numpy as jnp
from jax import lax
from jax.experimental import pallas as pl
from jax.experimental.pallas import tpu as pltpu


# ---------------------------------------------------------------------------
# helpers
# ---------------------------------------------------------------------------
def _ntuple(n):
    def parse(x):
        if isinstance(x, collections.abc.Iterable):
            return tuple(x)
        return tuple(repeat(x, n))
    return parse


to_2tuple = _ntuple(2)


def _round_up(x, m):
    return ((x + m - 1) // m) * m


def _cdiv(a, b):
    return -(-a // b)


def _pick_tm(M):
    """Pick the M tile: (8,128)-aligned, <= 512, prefer exact division of M
    (no row padding) and >= 2 tiles so megacore gets >= 2 parallel blocks."""
    Ma = _round_up(M, 8)
    if Ma <= 128:
        return Ma                       # tiny problem: single tile
    for tm in range(512, 63, -8):       # largest divisor tile with >= 2 tiles
        if Ma % tm == 0 and Ma // tm >= 2:
            return tm
    # Otherwise split into the fewest near-equal tiles (>= 2) of size <= 512.
    n_tiles = max(2, _cdiv(Ma, 512))
    return _round_up(_cdiv(Ma, n_tiles), 8)


# ---------------------------------------------------------------------------
# Pallas kernels: GEMM + bias (conv-as-GEMM core of PatchEmbed)
# ---------------------------------------------------------------------------
def _matmul_bias_single_k_kernel(a_ref, b_ref, bias_ref, o_ref):
    # Whole K resident: one MXU pass per (i, j) tile, bias added in-register.
    o_ref[...] = (
        jnp.dot(a_ref[...], b_ref[...], preferred_element_type=jnp.float32)
        + bias_ref[...].astype(jnp.float32)
    ).astype(o_ref.dtype)


def _matmul_bias_multi_k_kernel(a_ref, b_ref, bias_ref, o_ref, acc_ref):
    # K (reduction) is grid axis 2; f32 accumulator lives across it.
    @pl.when(pl.program_id(2) == 0)
    def _():
        # Fold the bias into the accumulator init (saves a separate add pass).
        acc_ref[...] = jnp.broadcast_to(
            bias_ref[...].astype(jnp.float32), acc_ref.shape)

    acc_ref[...] += jnp.dot(
        a_ref[...], b_ref[...], preferred_element_type=jnp.float32)

    @pl.when(pl.program_id(2) == pl.num_programs(2) - 1)
    def _():
        o_ref[...] = acc_ref[...].astype(o_ref.dtype)


def _matmul_bias(a, b, bias, out_dtype):
    """out = a @ b + bias via a tiled/pipelined Pallas kernel.

    a: (M, K), b: (K, N), bias: (N,). Pads to tile multiples only when
    required and slices back.
    """
    M, K = a.shape
    K2, N = b.shape
    assert K == K2 and bias.shape == (N,)

    a_item = jnp.dtype(a.dtype).itemsize
    b_item = jnp.dtype(b.dtype).itemsize
    o_item = jnp.dtype(out_dtype).itemsize

    # ---- N tile: full lane-dense embed_dim whenever it fits comfortably ----
    N_full = _round_up(N, 128)
    TN = N_full if N_full <= 1024 else 512
    N_pad = _round_up(N, TN)

    # ---- K tile: full K when it fits -> weight resident, single K step ----
    K_full = _round_up(K, 128)
    TK = K_full if K_full <= 1024 else 512
    K_pad = _round_up(K, TK)
    single_k = (K_pad == TK)

    # ---- M tile ----
    TM = _pick_tm(M)
    M_pad = _round_up(M, TM)

    # Pads are skipped when they are no-ops (avoids an HBM round-trip of A).
    def _maybe_pad(x, tgt):
        pads = tuple((0, t - s) for s, t in zip(x.shape, tgt))
        return x if all(p == 0 for _, p in pads) else jnp.pad(x, pads)

    a_p = _maybe_pad(a, (M_pad, K_pad))
    b_p = _maybe_pad(b, (K_pad, N_pad))
    bias_p = _maybe_pad(bias.reshape(1, N), (1, N_pad))

    n_i, n_j, n_k = M_pad // TM, N_pad // TN, K_pad // TK

    # Cost hint: dtype-accurate bytes, counting weight-tile revisits across i.
    a_reads = 1 if single_k else n_j
    b_reads = 1 if (n_j == 1 and n_k == 1) else n_i
    cost = pl.CostEstimate(
        flops=2 * M_pad * K_pad * N_pad,
        transcendentals=0,
        bytes_accessed=(a_reads * M_pad * K_pad * a_item
                        + b_reads * K_pad * N_pad * b_item
                        + M_pad * N_pad * o_item
                        + N_pad * b_item),
    )

    # Scoped-VMEM request sized to the double-buffered working set (+margin),
    # capped so the enlarged tiles also fit v5e and stay well under v7x's
    # 64 MiB physical VMEM.
    work = (2 * (TM * TK * a_item + TK * TN * b_item + TN * b_item)
            + 2 * TM * TN * o_item
            + (0 if single_k else TM * TN * 4))
    vmem_limit = int(min(28 << 20, max(16 << 20, work * 3 // 2 + (4 << 20))))

    if single_k:
        grid = (n_i, n_j)
        kernel = _matmul_bias_single_k_kernel
        in_specs = [
            pl.BlockSpec((TM, TK), lambda i, j: (i, 0)),
            pl.BlockSpec((TK, TN), lambda i, j: (0, j)),
            pl.BlockSpec((1, TN), lambda i, j: (0, j)),
        ]
        out_specs = pl.BlockSpec((TM, TN), lambda i, j: (i, j))
        scratch_shapes = []
        dims = ("parallel", "parallel")
    else:
        grid = (n_i, n_j, n_k)
        kernel = _matmul_bias_multi_k_kernel
        in_specs = [
            pl.BlockSpec((TM, TK), lambda i, j, k: (i, k)),
            pl.BlockSpec((TK, TN), lambda i, j, k: (k, j)),
            pl.BlockSpec((1, TN), lambda i, j, k: (0, j)),
        ]
        out_specs = pl.BlockSpec((TM, TN), lambda i, j, k: (i, j))
        scratch_shapes = [pltpu.VMEM((TM, TN), jnp.float32)]
        dims = ("parallel", "parallel", "arbitrary")

    out = pl.pallas_call(
        kernel,
        out_shape=jax.ShapeDtypeStruct((M_pad, N_pad), out_dtype),
        grid_spec=pltpu.PrefetchScalarGridSpec(
            num_scalar_prefetch=0,
            grid=grid,
            in_specs=in_specs,
            out_specs=out_specs,
            scratch_shapes=scratch_shapes,
        ),
        compiler_params=pltpu.CompilerParams(
            dimension_semantics=dims,
            vmem_limit_bytes=vmem_limit,
        ),
        cost_estimate=cost,
    )(a_p, b_p, bias_p)

    if M_pad != M or N_pad != N:
        out = out[:M, :N]
    return out


# ---------------------------------------------------------------------------
# PatchEmbed forward
# ---------------------------------------------------------------------------
def patch_embed_forward(x, weight, bias, patch_size, flatten=True,
                        gemm_dtype=None):
    """x: (B, C, H, W); weight: (E, C, Ph, Pw) (PyTorch conv layout); bias: (E,)."""
    B, C, H, W = x.shape
    Ph, Pw = patch_size
    assert H % Ph == 0 and W % Pw == 0
    Hp, Wp = H // Ph, W // Pw
    E = weight.shape[0]

    # im2col / patchify: layout plumbing only (no compute), done by XLA.
    # TODO(synk): fuse the patchify transpose into the kernel's input DMA
    # (allow_input_fusion / in-kernel strip rearrange) to save one HBM
    # round-trip of x; kept XLA-side here for robustness.
    patches = x.reshape(B, C, Hp, Ph, Wp, Pw)
    patches = patches.transpose(0, 2, 4, 1, 3, 5)          # (B, Hp, Wp, C, Ph, Pw)
    a = patches.reshape(B * Hp * Wp, C * Ph * Pw)           # (M, K)

    # Conv weight (E, C, Ph, Pw) -> GEMM rhs (K, E), same (c, ph, pw) order.
    bm = weight.reshape(E, C * Ph * Pw).T                    # (K, N)

    if gemm_dtype is not None:
        a = a.astype(gemm_dtype)
        bm = bm.astype(gemm_dtype)

    out = _matmul_bias(a, bm, bias, x.dtype)                 # (M, E)
    out = out.reshape(B, Hp * Wp, E)                         # patch tokens

    if not flatten:
        out = out.reshape(B, Hp, Wp, E).transpose(0, 3, 1, 2)   # (B, E, Hp, Wp)
    return out


class PatchEmbed:
    """JAX/Pallas port of the PyTorch PatchEmbed module (norm_layer=None -> Identity)."""

    def __init__(self, img_size=224, patch_size=16, in_chans=3, embed_dim=768,
                 norm_layer=None, flatten=True, *, key=None, dtype=jnp.float32,
                 gemm_dtype=None):
        img_size = to_2tuple(img_size)
        patch_size = to_2tuple(patch_size)
        self.img_size = img_size
        self.patch_size = patch_size
        self.grid_size = (img_size[0] // patch_size[0], img_size[1] // patch_size[1])
        self.num_patches = self.grid_size[0] * self.grid_size[1]
        self.flatten = flatten
        self.gemm_dtype = gemm_dtype
        # TODO(synk): norm_layer (e.g. LayerNorm) not implemented; default None -> Identity.
        assert norm_layer is None, "only norm_layer=None (Identity) is supported"

        if key is None:
            key = jax.random.PRNGKey(0)
        wk, bk = jax.random.split(key)
        fan_in = in_chans * patch_size[0] * patch_size[1]
        bound = 1.0 / math.sqrt(fan_in)     # nn.Conv2d default init
        self.weight = jax.random.uniform(
            wk, (embed_dim, in_chans, patch_size[0], patch_size[1]),
            dtype=dtype, minval=-bound, maxval=bound)
        self.bias = jax.random.uniform(
            bk, (embed_dim,), dtype=dtype, minval=-bound, maxval=bound)

    def __call__(self, x):
        B, C, H, W = x.shape
        assert H == self.img_size[0] and W == self.img_size[1], (
            f"Input image size ({H}*{W}) doesn't match model "
            f"({self.img_size[0]}*{self.img_size[1]})."
        )
        return patch_embed_forward(x, self.weight, self.bias,
                                   self.patch_size, self.flatten,
                                   gemm_dtype=self.gemm_dtype)


# ---------------------------------------------------------------------------
# Pure-JAX reference for validation
# ---------------------------------------------------------------------------
def _reference(x, weight, bias, patch_size, flatten=True):
    y = lax.conv_general_dilated(
        x, weight,
        window_strides=patch_size,
        padding="VALID",
        dimension_numbers=("NCHW", "OIHW", "NCHW"),
        precision=lax.Precision.HIGHEST,
    )
    y = y + bias.reshape(1, -1, 1, 1)
    if flatten:
        B, E, Hp, Wp = y.shape
        y = y.reshape(B, E, Hp * Wp).transpose(0, 2, 1)   # (B, num_patches, E)
    return y


if __name__ == "__main__":
    key = jax.random.PRNGKey(0)

    # ---- 1. Small smoke test (single tile, single K step) ----
    k1, k2, key = jax.random.split(key, 3)
    B, C, HW, patch, E = 2, 4, 16, 8, 32
    x = jax.random.normal(k1, (B, C, HW, HW), dtype=jnp.float32)
    mod = PatchEmbed(img_size=HW, patch_size=patch, in_chans=C, embed_dim=E, key=k2)
    y = mod(x)
    jax.block_until_ready(y)
    y_ref = _reference(x, mod.weight, mod.bias, mod.patch_size, flatten=True)
    assert y.shape == (B, (HW // patch) ** 2, E), y.shape
    assert y.dtype == x.dtype
    assert jnp.allclose(y, y_ref, rtol=2e-3, atol=2e-3), "mismatch vs reference (flatten)"

    y_nf = patch_embed_forward(x, mod.weight, mod.bias, mod.patch_size, flatten=False)
    y_nf_ref = _reference(x, mod.weight, mod.bias, mod.patch_size, flatten=False)
    assert jnp.allclose(y_nf, y_nf_ref, rtol=2e-3, atol=2e-3), "mismatch (no flatten)"

    # ---- 2. ViT-like shape: multiple parallel M tiles, full-K single-step GEMM ----
    k1, k2, key = jax.random.split(key, 3)
    x2 = jax.random.normal(k1, (1, 3, 224, 224), dtype=jnp.float32)
    mod2 = PatchEmbed(img_size=224, patch_size=16, in_chans=3, embed_dim=256, key=k2)
    y2 = mod2(x2)
    jax.block_until_ready(y2)
    y2_ref = _reference(x2, mod2.weight, mod2.bias, mod2.patch_size, flatten=True)
    assert y2.shape == (1, 196, 256), y2.shape
    assert jnp.allclose(y2, y2_ref, rtol=5e-3, atol=5e-3), "mismatch vs reference (ViT)"

    # ---- 3. K > 1024: exercises the multi-K-step accumulator path ----
    k1, k2, key = jax.random.split(key, 3)
    x3 = jax.random.normal(k1, (2, 8, 32, 32), dtype=jnp.float32)
    mod3 = PatchEmbed(img_size=32, patch_size=16, in_chans=8, embed_dim=128, key=k2)
    y3 = mod3(x3)
    jax.block_until_ready(y3)
    y3_ref = _reference(x3, mod3.weight, mod3.bias, mod3.patch_size, flatten=True)
    assert y3.shape == (2, 4, 128), y3.shape
    assert jnp.allclose(y3, y3_ref, rtol=5e-3, atol=5e-3), "mismatch vs reference (multi-K)"

    print("KERNEL_OK")
</pallas_src>

<mosaic_0001>
module attributes {stable_mosaic.version = 11 : i64} {
  func.func @_matmul_bias_single_k_kernel(%arg0: i32, %arg1: i32, %arg2: memref<8x256xf32, #tpu.memory_space<vmem>>, %arg3: memref<256x128xf32, #tpu.memory_space<vmem>>, %arg4: memref<1x128xf32, #tpu.memory_space<vmem>>, %arg5: memref<8x128xf32, #tpu.memory_space<vmem>>) attributes {dimension_semantics = [#tpu.dimension_semantics<parallel>, #tpu.dimension_semantics<parallel>], iteration_bounds = array<i64: 1, 1>, scalar_prefetch = 0 : i64, scratch_operands = 0 : i64, tpu.core_type = #tpu.core_type<tc>, window_params = [{transform_indices = @transform_0, window_bounds = array<i64: 8, 256>}, {transform_indices = @transform_1, window_bounds = array<i64: 256, 128>}, {transform_indices = @transform_2, window_bounds = array<i64: 1, 128>}, {transform_indices = @transform_3, window_bounds = array<i64: 8, 128>}]} {
    %c0 = arith.constant 0 : index
    %c0_0 = arith.constant 0 : index
    %0 = vector.load %arg2[%c0, %c0_0] : memref<8x256xf32, #tpu.memory_space<vmem>>, vector<8x256xf32>
    %c0_1 = arith.constant 0 : index
    %c0_2 = arith.constant 0 : index
    %1 = vector.load %arg3[%c0_1, %c0_2] : memref<256x128xf32, #tpu.memory_space<vmem>>, vector<256x128xf32>
    %cst = arith.constant dense<0.000000e+00> : vector<8x128xf32>
    %2 = tpu.matmul %0, %1, %cst {dimension_numbers = #tpu.dot_dimension_numbers<[1], [0], [0], [1], [0, 0, 1, 1], [], []>} : vector<8x256xf32>, vector<256x128xf32>, vector<8x128xf32> -> vector<8x128xf32>
    %c0_3 = arith.constant 0 : index
    %c0_4 = arith.constant 0 : index
    %3 = vector.load %arg4[%c0_3, %c0_4] : memref<1x128xf32, #tpu.memory_space<vmem>>, vector<1x128xf32>
    %4 = vector.broadcast %3 : vector<1x128xf32> to vector<8x128xf32>
    %5 = arith.addf %2, %4 : vector<8x128xf32>
    %c0_5 = arith.constant 0 : index
    %c0_6 = arith.constant 0 : index
    %6 = vector.load %arg5[%c0_5, %c0_6] : memref<8x128xf32, #tpu.memory_space<vmem>>, vector<8x128xf32>
    tpu.vector_store %arg5[%c0_5, %c0_6], %5 {strides = array<i32>} : memref<8x128xf32, #tpu.memory_space<vmem>>, vector<8x128xf32>,
    return
  }
  func.func @transform_0(%arg0: i32, %arg1: i32) -> (i32, i32) {
    %c0_i32 = arith.constant 0 : i32
    %c0_i32_0 = arith.constant 0 : i32
    return %arg0, %c0_i32 : i32, i32
  }
  func.func @transform_1(%arg0: i32, %arg1: i32) -> (i32, i32) {
    %c0_i32 = arith.constant 0 : i32
    %c0_i32_0 = arith.constant 0 : i32
    return %c0_i32, %arg1 : i32, i32
  }
  func.func @transform_2(%arg0: i32, %arg1: i32) -> (i32, i32) {
    %c0_i32 = arith.constant 0 : i32
    %c0_i32_0 = arith.constant 0 : i32
    return %c0_i32, %arg1 : i32, i32
  }
  func.func @transform_3(%arg0: i32, %arg1: i32) -> (i32, i32) {
    %c0_i32 = arith.constant 0 : i32
    return %arg0, %arg1 : i32, i32
  }
}

</mosaic_0001>

<bundles_post_ra>
// kernel: tpu_custom_call.1
= control target key start
LH: loop header
LB: loop body
LE: loop exit
PB: predicated region body
PF: predicated region fallthrough
CT: control target
= control target key end

     0   :  { %8 = vsyncpa [#allocation3], 0  ;;  %s385_s0 = inlined_call_operand.hbm [shape: f32[8,256], index: 0, kind: input, shape index: {}]   ;;  %s386_s1 = inlined_call_operand.hbm [shape: f32[256,128], index: 1, kind: input, shape index: {}]   ;;  %s387_s2 = inlined_call_operand.vmem [shape: f32[1,128], index: 2, kind: input, shape index: {}]   ;;  %s388_s3 = inlined_call_operand.hbm [shape: f32[8,128], index: 3, kind: output, shape index: {}]  }
   0x1   :  { %9 = vsyncpa [#allocation6], 0 }
   0x2   :  { %10 = vsyncpa [#allocation4], 0  ;;  %s314_s12 = smov [#allocation2]   ;;  %s315_s14 = smov [#allocation5]  }
   0x3   :  { %s17_s13 = sshll.u32 %s314_s12, 4  ;;  %s26_s15 = sshll.u32 %s315_s14, 4  ;;  %s18_s13 = int_to_ptr.vmem [resolvable:$true] %s17_s13  ;;  %s339_s15 = int_to_ptr.vmem [resolvable:$true] %s26_s15 }
   0x4   :  { %s242_s18 = scalar_lea.hbm %s385_s0, 256 }
   0x5   :  { %p243_p0 = scmp.ne.s32.totalorder %s385_s0, %s242_s18  ;;  %p246_p1 = scmp.lt.u32.totalorder %s242_s18, %s385_s0 }
   0x7   :  { %p248_p2 = pnand %p246_p1, %p243_p0 }
   0x9   :  { %251 = shalt.err (!%p248_p2)
}
   0xa   :  { %s252_s23 = scalar_lea.vmem %s18_s13, 256  ;;  %p257_p4 = scmp.lt.s32.totalorder %s18_s13, %s18_s13 }
   0xb   :  { %p253_p3 = scmp.ne.s32.totalorder %s18_s13, %s252_s23  ;;  %p258_p5 = scmp.lt.s32.totalorder %s252_s23, %s252_s23 }
   0xd   :  { %p259_p6 = por %p258_p5, %p257_p4 }
   0xf   :  { %p260_p7 = pnand %p259_p6, %p253_p3 }
  0x11   :  { %263 = shalt.err (!%p260_p7)
}
  0x12   :  { %20 = dma.hbm_to_vmem [thread:$0]  %s385_s0, 256, %s18_s13, [#allocation3]  }
  0x13   :  { %s264_s28 = scalar_lea.hbm %s386_s1, 4096 }
  0x14   :  { %p265_p8 = scmp.ne.s32.totalorder %s386_s1, %s264_s28  ;;  %p268_p9 = scmp.lt.u32.totalorder %s264_s28, %s386_s1 }
  0x16   :  { %p270_p10 = pnand %p268_p9, %p265_p8 }
  0x18   :  { %273 = shalt.err (!%p270_p10)
}
  0x19   :  { %s274_s6 = scalar_lea.vmem %s339_s15, 4096  ;;  %p279_p12 = scmp.lt.s32.totalorder %s339_s15, %s339_s15 }
  0x1a   :  { %p275_p11 = scmp.ne.s32.totalorder %s339_s15, %s274_s6  ;;  %p280_p13 = scmp.lt.s32.totalorder %s274_s6, %s274_s6 }
  0x1c   :  { %p281_p0 = por %p280_p13, %p279_p12 }
  0x1e   :  { %p282_p1 = pnand %p281_p0, %p275_p11 }
  0x20   :  { %285 = shalt.err (!%p282_p1)
}
  0x21   :  { %s316_s0 = smov 128   ;;  %s317_s7 = smov 8  }
  0x22   :  { %32 = dma.hbm_to_vmem [thread:$0]  %s386_s1, 4096, %s339_s15, [#allocation6], %s316_s0, %s316_s0, %s317_s7  }
  0x23   :  { %308 = dma.done.wait [#allocation3], 256  }
  0x24   :  { %309 = vsyncadd [#allocation3], 4294967040 }
  0x25   :  { %310 = dma.done.wait [#allocation6], 4096  }
  0x26   :  { %311 = vsyncadd [#allocation6], 4294963200  ;;  %v59_v0 = vld [vmem:[#allocation5 + $0x80] sm:$0xff]  ;;  %v60_v1 = vld [vmem:[#allocation5 + $0x88] sm:$0xff]  ;;  %s318_s11 = smov [#allocation7]  }
  0x27   :  { %v43_v2 = vld [vmem:[#allocation5] sm:$0xff]  ;;  %v205_v3 = vpack.c.bf16 %v60_v1, %v59_v0  ;;  %v44_v4 = vld [vmem:[#allocation5 + $0x8] sm:$0xff]  ;;  %v61_v5 = vld [vmem:[#allocation5 + $0x90] sm:$0xff]  ;;  %s159_s12 = sshll.u32 %s318_s11, 4  ;;  %s160_s12 = int_to_ptr.vmem [resolvable:$true] %s159_s12 }
  0x28   :  { %v62_v6 = vld [vmem:[#allocation5 + $0x98] sm:$0xff]  ;;  %v207_v7 = vpack.c.bf16 %v44_v4, %v43_v2  ;;  %v45_v9 = vld [vmem:[#allocation5 + $0x10] sm:$0xff]  ;;  %v63_v11 = vld [vmem:[#allocation5 + $0xa0] sm:$0xff]  ;;  %s286_s13 = scalar_lea.vmem %s160_s12, 128  ;;  %p291_p3 = scmp.lt.s32.totalorder %s160_s12, %s160_s12 }
  0x29   :  { %v209_v8 = vpack.c.bf16 %v62_v6, %v61_v5  ;;  %v46_v10 = vld [vmem:[#allocation5 + $0x18] sm:$0xff]  ;;  %206 = vmatprep.subr.bf16.mxu0 %v205_v3  ;;  %v64_v12 = vld [vmem:[#allocation5 + $0xa8] sm:$0xff]  ;;  %v47_v15 = vld [vmem:[#allocation5 + $0x20] sm:$0xff]  ;;  %p287_p2 = scmp.ne.s32.totalorder %s160_s12, %s286_s13  ;;  %p292_p4 = scmp.lt.s32.totalorder %s286_s13, %s286_s13 }
  0x2a   :  { %208 = vmatpush3.bf16.msra.mxu0 %v207_v7  ;;  %v211_v13 = vpack.c.bf16 %v46_v10, %v45_v9  ;;  %v213_v14 = vpack.c.bf16 %v64_v12, %v63_v11  ;;  %v48_v16 = vld [vmem:[#allocation5 + $0x28] sm:$0xff]  ;;  %v65_v17 = vld [vmem:[#allocation5 + $0xb0] sm:$0xff]  ;;  %v66_v18 = vld [vmem:[#allocation5 + $0xb8] sm:$0xff] }
  0x2b   :  { %210 = vmatprep.subr.bf16.mxu0 %v209_v8  ;;  %v215_v19 = vpack.c.bf16 %v48_v16, %v47_v15  ;;  %v217_v20 = vpack.c.bf16 %v66_v18, %v65_v17  ;;  %v49_v21 = vld [vmem:[#allocation5 + $0x30] sm:$0xff]  ;;  %v50_v22 = vld [vmem:[#allocation5 + $0x38] sm:$0xff]  ;;  %v67_v23 = vld [vmem:[#allocation5 + $0xc0] sm:$0xff]  ;;  %p293_p5 = por %p292_p4, %p291_p3 }
  0x2c   :  { %v68_v24 = vld [vmem:[#allocation5 + $0xc8] sm:$0xff]  ;;  %v42_v25 = vld [vmem:[#allocation2 + $0x8] sm:$0xff]  ;;  %v219_v26 = vpack.c.bf16 %v50_v22, %v49_v21  ;;  %v51_v28 = vld [vmem:[#allocation5 + $0x40] sm:$0xff] }
  0x2d   :  { %146 = vmatprep.mubr.f32.mxu0 %v42_v25  ;;  %v221_v27 = vpack.c.bf16 %v68_v24, %v67_v23  ;;  %v52_v29 = vld [vmem:[#allocation5 + $0x48] sm:$0xff]  ;;  %v69_v30 = vld [vmem:[#allocation5 + $0xd0] sm:$0xff]  ;;  %v70_v31 = vld [vmem:[#allocation5 + $0xd8] sm:$0xff]  ;;  %p294_p6 = pnand %p293_p5, %p287_p2 }
  0x2e   :  { %212 = vmatpush3.bf16.msra.mxu0 %v211_v13  ;;  %v223_v32 = vpack.c.bf16 %v52_v29, %v51_v28  ;;  %v225_v33 = vpack.c.bf16 %v70_v31, %v69_v30  ;;  %v53_v34 = vld [vmem:[#allocation5 + $0x50] sm:$0xff]  ;;  %v54_v35 = vld [vmem:[#allocation5 + $0x58] sm:$0xff]  ;;  %v71_v36 = vld [vmem:[#allocation5 + $0xe0] sm:$0xff] }
  0x2f   :  { %214 = vmatprep.subr.bf16.mxu0 %v213_v14  ;;  %v72_v37 = vld [vmem:[#allocation5 + $0xe8] sm:$0xff]  ;;  %v227_v38 = vpack.c.bf16 %v54_v35, %v53_v34  ;;  %v55_v40 = vld [vmem:[#allocation5 + $0x60] sm:$0xff]  ;;  %v73_v42 = vld [vmem:[#allocation5 + $0xf0] sm:$0xff] }
  0x30   :  { %v229_v39 = vpack.c.bf16 %v72_v37, %v71_v36  ;;  %v56_v41 = vld [vmem:[#allocation5 + $0x68] sm:$0xff]  ;;  %v74_v43 = vld [vmem:[#allocation5 + $0xf8] sm:$0xff]  ;;  %v57_v46 = vld [vmem:[#allocation5 + $0x70] sm:$0xff] }
  0x31   :  { %v231_v44 = vpack.c.bf16 %v56_v41, %v55_v40  ;;  %v233_v45 = vpack.c.bf16 %v74_v43, %v73_v42  ;;  %v58_v47 = vld [vmem:[#allocation5 + $0x78] sm:$0xff]  ;;  %v41_v49 = vld [vmem:[#allocation2] sm:$0xff] }
  0x32   :  { %216 = vmatpush3.bf16.msra.mxu0 %v215_v19  ;;  %v235_v48 = vpack.c.bf16 %v58_v47, %v57_v46  ;;  %v169_v51 = vld [vmem:[%s387_s2] ss:$0 sm:$0xff] }
  0x33   :  { %218 = vmatprep.subr.bf16.mxu0 %v217_v20 }
  0x36   :  { %220 = vmatpush3.bf16.msra.mxu0 %v219_v26 }
  0x37   :  { %222 = vmatprep.subr.bf16.mxu0 %v221_v27 }
  0x3a   :  { %224 = vmatpush3.bf16.msra.mxu0 %v223_v32 }
  0x3b   :  { %226 = vmatprep.subr.bf16.mxu0 %v225_v33 }
  0x3e   :  { %228 = vmatpush3.bf16.msra.mxu0 %v227_v38 }
  0x3f   :  { %230 = vmatprep.subr.bf16.mxu0 %v229_v39 }
  0x42   :  { %232 = vmatpush3.bf16.msra.mxu0 %v231_v44 }
  0x43   :  { %234 = vmatprep.subr.bf16.mxu0 %v233_v45 }
  0x46   :  { %236 = vmatpush3.bf16.msra.mxu0 %v235_v48 }
  0x49   :  { %147 = vmatmul.mubr.f32.vlgmr.msra.gmra.mrb[0].mxu0 %v41_v49 }
 0x11c   :  { %v202_v50 = vpop.f32.mrb[0].mxu0 }
 0x11d   :  { %v203_v52 = vpop.f32.mrb[1].mxu0 }
 0x11e   :  { %v204_v53 = vadd.f32 %v203_v52, %v202_v50 }
 0x120   :  { %v149_v54 = vadd.f32 %v204_v53, %v169_v51 }
 0x122   :  { %152 = vst [vmem:[#allocation7] sm:$0xff] %v149_v54 }
 0x123   :  { %297 = shalt.err (!%p294_p6)
}
 0x124   :  { %s298_s16 = scalar_lea.hbm %s388_s3, 128 }
 0x125   :  { %p299_p7 = scmp.ne.s32.totalorder %s388_s3, %s298_s16  ;;  %p302_p8 = scmp.lt.u32.totalorder %s298_s16, %s388_s3 }
 0x127   :  { %p304_p9 = pnand %p302_p8, %p299_p7 }
 0x129   :  { %307 = shalt.err (!%p304_p9)
}
 0x12a   :  { %162 = dma.vmem_to_hbm [thread:$0]  %s160_s12, 128, %s388_s3, [#allocation4]  }
 0x12b   :  { %312 = dma.done.wait [#allocation4], 128  }
 0x12c   :  { %313 = vsyncadd [#allocation4], 4294967168 }
 0x12d   :  { %166 = vsyncpa [#allocation3], 1 }
 0x12e   :  { %167 = vsyncpa [#allocation6], 1 }
 0x12f   :  { %168 = vsyncpa [#allocation4], 1 }

</bundles_post_ra>
